<compile_context>
chip_gen: v7x
topology: tpu7x:2x2x1
jax: 0.10.0
libtpu: 0.0.40
codegen_flags: <defaults>
</compile_context>

<pallas_src>
import jax
import jax.numpy as jnp
from jax.experimental import pallas as pl
from jax.experimental.pallas import tpu as pltpu


def _round_up(n, m):
    return ((n + m - 1) // m) * m


def mlp_kernel(x_ref, w1_ref, b1_ref, w2_ref, b2_ref, w3_ref, b3_ref, o_ref):
    # In-kernel cast to bf16 (VPU) -> MXU matmul with f32 accumulation.
    x = x_ref[...].astype(jnp.bfloat16)
    # Layer 1: Linear + ReLU.
    h = jnp.dot(x, w1_ref[...], preferred_element_type=jnp.float32)
    h = jnp.maximum(h + b1_ref[...], 0.0)
    # Layer 2: Linear + ReLU.
    h = jnp.dot(h.astype(jnp.bfloat16), w2_ref[...],
                preferred_element_type=jnp.float32)
    h = jnp.maximum(h + b2_ref[...], 0.0)
    # Layer 3: Linear (no activation).
    out = jnp.dot(h.astype(jnp.bfloat16), w3_ref[...],
                  preferred_element_type=jnp.float32) + b3_ref[...]
    o_ref[...] = out.astype(o_ref.dtype)


def _pick_batch_tile(B, batch_tile):
    """Tile rows: multiple of 16; grid has >= 2 (even) steps whenever B > 16."""
    tb_cap = max(16, (int(batch_tile) // 16) * 16)
    if B <= 16:
        return 16
    n_steps = max(2, pl.cdiv(B, tb_cap))
    if n_steps % 2:
        n_steps += 1          # even step count -> balanced work on v7x's 2 TCs
    return max(16, _round_up(pl.cdiv(B, n_steps), 16))


def _vmem_limit_bytes(tb, d_in, hidden, d_out):
    """Estimate scoped-VMEM need from the actual buffers (+ headroom)."""
    lane = 128
    d_in_l = _round_up(d_in, lane)    # VMEM layout pads the lane axis anyway
    d_out_l = _round_up(d_out, lane)
    x_tile = tb * d_in_l * 4                                   # f32 input tile
    o_tile = tb * d_out_l * 4                                  # f32 output tile
    w_bytes = (d_in_l * hidden + hidden * hidden + hidden * d_out_l) * 2  # bf16
    b_bytes = (hidden + hidden + d_out_l) * 4                  # f32 biases
    act = 2 * tb * hidden * 4                                  # intermediates
    # Pipelined operands are double-buffered; 2x overall headroom for compiler
    # scratch / register spill, floored at 16 MiB, capped at 56 MiB (v7x-safe).
    need = 2 * (x_tile + o_tile + w_bytes + b_bytes) + act
    return int(min(max(2 * need, 16 << 20), 56 << 20))


def mlp_forward(x, params, *, batch_tile=2048):
    """Fused 3-layer MLP forward. x: (B, D_in) float32."""
    w1, b1, w2, b2, w3, b3 = params
    B, d_in = x.shape
    hidden = w1.shape[1]          # 128 per the module spec (lane-aligned)
    d_out = w3.shape[1]
    out_dtype = x.dtype

    # bf16 weight operands for the MXU (tiny, resident across the grid);
    # biases stay f32 (added post-accumulation). x stays f32 in HBM.
    w1_bf = w1.astype(jnp.bfloat16)
    w2_bf = w2.astype(jnp.bfloat16)
    w3_bf = w3.astype(jnp.bfloat16)
    b1_f = b1.astype(jnp.float32)
    b2_f = b2.astype(jnp.float32)
    b3_f = b3.astype(jnp.float32)

    tb = _pick_batch_tile(B, batch_tile)
    grid = (pl.cdiv(B, tb),)
    vmem_limit = _vmem_limit_bytes(tb, d_in, hidden, d_out)

    out = pl.pallas_call(
        mlp_kernel,
        out_shape=jax.ShapeDtypeStruct((B, d_out), out_dtype),
        grid_spec=pltpu.PrefetchScalarGridSpec(
            num_scalar_prefetch=0,
            grid=grid,
            in_specs=[
                # x tile streams over the batch axis (native feature width:
                # last block dim == full array dim is legal even if < 128).
                pl.BlockSpec((tb, d_in), lambda i: (i, 0)),
                # Weights / biases: constant index_map -> DMA'd once, resident.
                pl.BlockSpec((d_in, hidden), lambda i: (0, 0)),
                pl.BlockSpec((1, hidden), lambda i: (0, 0)),
                pl.BlockSpec((hidden, hidden), lambda i: (0, 0)),
                pl.BlockSpec((1, hidden), lambda i: (0, 0)),
                pl.BlockSpec((hidden, d_out), lambda i: (0, 0)),
                pl.BlockSpec((1, d_out), lambda i: (0, 0)),
            ],
            # Native-width output block: no lane padding, no post-kernel slice.
            out_specs=pl.BlockSpec((tb, d_out), lambda i: (i, 0)),
        ),
        compiler_params=pltpu.CompilerParams(
            dimension_semantics=("parallel",),
            vmem_limit_bytes=vmem_limit,
        ),
    )(x, w1_bf, b1_f, w2_bf, b2_f, w3_bf, b3_f)

    return out


def init_mlp_params(key, input_dim, output_dim, hidden=128, dtype=jnp.float32):
    """Deterministic init mimicking nn.Linear's uniform(-1/sqrt(fan_in), +1/sqrt(fan_in))."""
    def linear_init(k, fan_in, fan_out):
        kw, kb = jax.random.split(k)
        bound = 1.0 / jnp.sqrt(fan_in)
        w = jax.random.uniform(kw, (fan_in, fan_out), dtype, -bound, bound)
        b = jax.random.uniform(kb, (1, fan_out), dtype, -bound, bound)
        return w, b

    k1, k2, k3 = jax.random.split(key, 3)
    w1, b1 = linear_init(k1, input_dim, hidden)
    w2, b2 = linear_init(k2, hidden, hidden)
    w3, b3 = linear_init(k3, hidden, output_dim)
    return (w1, b1, w2, b2, w3, b3)


def mlp_reference(x, params):
    """Pure-JAX f32 reference (semantics of the PyTorch module)."""
    w1, b1, w2, b2, w3, b3 = params
    h = jnp.maximum(x @ w1 + b1, 0.0)
    h = jnp.maximum(h @ w2 + b2, 0.0)
    return h @ w3 + b3


if __name__ == "__main__":
    key = jax.random.PRNGKey(0)
    kx, kp = jax.random.split(key)

    batch, input_dim, output_dim = 64, 32, 16
    x = jax.random.normal(kx, (batch, input_dim), dtype=jnp.float32)
    params = init_mlp_params(kp, input_dim, output_dim)

    # Tile derivation caps tb so the grid is (2,) even at this small batch,
    # exercising the pipelined / multi-step path.
    out = mlp_forward(x, params)
    out = jax.block_until_ready(out)

    ref = mlp_reference(x, params)
    assert out.shape == (batch, output_dim), out.shape
    # bf16 MXU operands with f32 accumulation -> loose-ish tolerance vs f32 ref.
    assert jnp.allclose(out, ref, atol=5e-2, rtol=5e-2), "mismatch vs reference"

    print("KERNEL_OK")
</pallas_src>

<mosaic_0001>
module attributes {stable_mosaic.version = 11 : i64} {
  func.func @mlp_kernel(%arg0: i32, %arg1: memref<32x32xf32, #tpu.memory_space<vmem>>, %arg2: memref<32x128xbf16, #tpu.memory_space<vmem>>, %arg3: memref<1x128xf32, #tpu.memory_space<vmem>>, %arg4: memref<128x128xbf16, #tpu.memory_space<vmem>>, %arg5: memref<1x128xf32, #tpu.memory_space<vmem>>, %arg6: memref<128x16xbf16, #tpu.memory_space<vmem>>, %arg7: memref<1x16xf32, #tpu.memory_space<vmem>>, %arg8: memref<32x16xf32, #tpu.memory_space<vmem>>) attributes {dimension_semantics = [#tpu.dimension_semantics<parallel>], iteration_bounds = array<i64: 2>, scalar_prefetch = 0 : i64, scratch_operands = 0 : i64, tpu.core_type = #tpu.core_type<tc>, window_params = [{transform_indices = @transform_0, window_bounds = array<i64: 32, 32>}, {pipeline_mode = #tpu.pipeline_mode<synchronous>, transform_indices = @transform_1, window_bounds = array<i64: 32, 128>}, {pipeline_mode = #tpu.pipeline_mode<synchronous>, transform_indices = @transform_2, window_bounds = array<i64: 1, 128>}, {pipeline_mode = #tpu.pipeline_mode<synchronous>, transform_indices = @transform_3, window_bounds = array<i64: 128, 128>}, {pipeline_mode = #tpu.pipeline_mode<synchronous>, transform_indices = @transform_4, window_bounds = array<i64: 1, 128>}, {pipeline_mode = #tpu.pipeline_mode<synchronous>, transform_indices = @transform_5, window_bounds = array<i64: 128, 16>}, {pipeline_mode = #tpu.pipeline_mode<synchronous>, transform_indices = @transform_6, window_bounds = array<i64: 1, 16>}, {transform_indices = @transform_7, window_bounds = array<i64: 32, 16>}]} {
    %c0 = arith.constant 0 : index
    %c0_0 = arith.constant 0 : index
    %0 = vector.load %arg1[%c0, %c0_0] : memref<32x32xf32, #tpu.memory_space<vmem>>, vector<32x32xf32>
    %1 = arith.truncf %0 : vector<32x32xf32> to vector<32x32xbf16>
    %c0_1 = arith.constant 0 : index
    %c0_2 = arith.constant 0 : index
    %2 = vector.load %arg2[%c0_1, %c0_2] : memref<32x128xbf16, #tpu.memory_space<vmem>>, vector<32x128xbf16>
    %cst = arith.constant dense<0.000000e+00> : vector<32x128xf32>
    %3 = tpu.matmul %1, %2, %cst {dimension_numbers = #tpu.dot_dimension_numbers<[1], [0], [0], [1], [0, 0, 1, 1], [], []>} : vector<32x32xbf16>, vector<32x128xbf16>, vector<32x128xf32> -> vector<32x128xf32>
    %c0_3 = arith.constant 0 : index
    %c0_4 = arith.constant 0 : index
    %4 = vector.load %arg3[%c0_3, %c0_4] : memref<1x128xf32, #tpu.memory_space<vmem>>, vector<1x128xf32>
    %5 = vector.broadcast %4 : vector<1x128xf32> to vector<32x128xf32>
    %6 = arith.addf %3, %5 : vector<32x128xf32>
    %cst_5 = arith.constant 0.000000e+00 : f32
    %7 = vector.broadcast %cst_5 : f32 to vector<32x128xf32>
    %8 = arith.maximumf %6, %7 : vector<32x128xf32>
    %9 = arith.truncf %8 : vector<32x128xf32> to vector<32x128xbf16>
    %c0_6 = arith.constant 0 : index
    %c0_7 = arith.constant 0 : index
    %10 = vector.load %arg4[%c0_6, %c0_7] : memref<128x128xbf16, #tpu.memory_space<vmem>>, vector<128x128xbf16>
    %cst_8 = arith.constant dense<0.000000e+00> : vector<32x128xf32>
    %11 = tpu.matmul %9, %10, %cst_8 {dimension_numbers = #tpu.dot_dimension_numbers<[1], [0], [0], [1], [0, 0, 1, 1], [], []>} : vector<32x128xbf16>, vector<128x128xbf16>, vector<32x128xf32> -> vector<32x128xf32>
    %c0_9 = arith.constant 0 : index
    %c0_10 = arith.constant 0 : index
    %12 = vector.load %arg5[%c0_9, %c0_10] : memref<1x128xf32, #tpu.memory_space<vmem>>, vector<1x128xf32>
    %13 = vector.broadcast %12 : vector<1x128xf32> to vector<32x128xf32>
    %14 = arith.addf %11, %13 : vector<32x128xf32>
    %cst_11 = arith.constant 0.000000e+00 : f32
    %15 = vector.broadcast %cst_11 : f32 to vector<32x128xf32>
    %16 = arith.maximumf %14, %15 : vector<32x128xf32>
    %17 = arith.truncf %16 : vector<32x128xf32> to vector<32x128xbf16>
    %c0_12 = arith.constant 0 : index
    %c0_13 = arith.constant 0 : index
    %18 = vector.load %arg6[%c0_12, %c0_13] : memref<128x16xbf16, #tpu.memory_space<vmem>>, vector<128x16xbf16>
    %cst_14 = arith.constant dense<0.000000e+00> : vector<32x16xf32>
    %19 = tpu.matmul %17, %18, %cst_14 {dimension_numbers = #tpu.dot_dimension_numbers<[1], [0], [0], [1], [0, 0, 1, 1], [], []>} : vector<32x128xbf16>, vector<128x16xbf16>, vector<32x16xf32> -> vector<32x16xf32>
    %c0_15 = arith.constant 0 : index
    %c0_16 = arith.constant 0 : index
    %20 = vector.load %arg7[%c0_15, %c0_16] : memref<1x16xf32, #tpu.memory_space<vmem>>, vector<1x16xf32>
    %21 = vector.broadcast %20 : vector<1x16xf32> to vector<32x16xf32>
    %22 = arith.addf %19, %21 : vector<32x16xf32>
    %c0_17 = arith.constant 0 : index
    %c0_18 = arith.constant 0 : index
    %23 = vector.load %arg8[%c0_17, %c0_18] : memref<32x16xf32, #tpu.memory_space<vmem>>, vector<32x16xf32>
    tpu.vector_store %arg8[%c0_17, %c0_18], %22 {strides = array<i32>} : memref<32x16xf32, #tpu.memory_space<vmem>>, vector<32x16xf32>,
    return
  }
  func.func @transform_0(%arg0: i32) -> (i32, i32) {
    %c0_i32 = arith.constant 0 : i32
    %c0_i32_0 = arith.constant 0 : i32
    return %arg0, %c0_i32 : i32, i32
  }
  func.func @transform_1(%arg0: i32) -> (i32, i32) {
    %c0_i32 = arith.constant 0 : i32
    %c0_i32_0 = arith.constant 0 : i32
    %c0_i32_1 = arith.constant 0 : i32
    return %c0_i32, %c0_i32_0 : i32, i32
  }
  func.func @transform_2(%arg0: i32) -> (i32, i32) {
    %c0_i32 = arith.constant 0 : i32
    %c0_i32_0 = arith.constant 0 : i32
    %c0_i32_1 = arith.constant 0 : i32
    return %c0_i32, %c0_i32_0 : i32, i32
  }
  func.func @transform_3(%arg0: i32) -> (i32, i32) {
    %c0_i32 = arith.constant 0 : i32
    %c0_i32_0 = arith.constant 0 : i32
    %c0_i32_1 = arith.constant 0 : i32
    return %c0_i32, %c0_i32_0 : i32, i32
  }
  func.func @transform_4(%arg0: i32) -> (i32, i32) {
    %c0_i32 = arith.constant 0 : i32
    %c0_i32_0 = arith.constant 0 : i32
    %c0_i32_1 = arith.constant 0 : i32
    return %c0_i32, %c0_i32_0 : i32, i32
  }
  func.func @transform_5(%arg0: i32) -> (i32, i32) {
    %c0_i32 = arith.constant 0 : i32
    %c0_i32_0 = arith.constant 0 : i32
    %c0_i32_1 = arith.constant 0 : i32
    return %c0_i32, %c0_i32_0 : i32, i32
  }
  func.func @transform_6(%arg0: i32) -> (i32, i32) {
    %c0_i32 = arith.constant 0 : i32
    %c0_i32_0 = arith.constant 0 : i32
    %c0_i32_1 = arith.constant 0 : i32
    return %c0_i32, %c0_i32_0 : i32, i32
  }
  func.func @transform_7(%arg0: i32) -> (i32, i32) {
    %c0_i32 = arith.constant 0 : i32
    %c0_i32_0 = arith.constant 0 : i32
    return %arg0, %c0_i32 : i32, i32
  }
}

</mosaic_0001>

<bundles_post_ra>
// kernel: tpu_custom_call.1
= control target key start
LH: loop header
LB: loop body
LE: loop exit
PB: predicated region body
PF: predicated region fallthrough
CT: control target
= control target key end

     0   :  { %s861_s24 = smov 0   ;;  %s948_s0 = inlined_call_operand.vmem [shape: f32[64,32], index: 0, kind: input, shape index: {}]   ;;  %s949_s1 = inlined_call_operand.vmem [shape: bf16[32,128], index: 1, kind: input, shape index: {}]   ;;  %s950_s2 = inlined_call_operand.vmem [shape: f32[1,128], index: 2, kind: input, shape index: {}]   ;;  %s951_s3 = inlined_call_operand.vmem [shape: bf16[128,128], index: 3, kind: input, shape index: {}]   ;;  %s952_s4 = inlined_call_operand.vmem [shape: f32[1,128], index: 4, kind: input, shape index: {}]   ;;  %s953_s5 = inlined_call_operand.vmem [shape: bf16[128,16], index: 5, kind: input, shape index: {}]   ;;  %s954_s6 = inlined_call_operand.vmem [shape: f32[1,16], index: 6, kind: input, shape index: {}]   ;;  %s955_s7 = inlined_call_operand.vmem [shape: f32[64,16], index: 7, kind: output, shape index: {}]  }
   0x1 LB: > { %s681_s25 = sadd.s32 4294967295, %s819_s24   ;;  %p685_p0 = scmp.ge.s32.totalorder %s819_s24, 1  ;;  %s819_s24 = sphi %s861_s24, %s17_s24  }
   0x2   : > { %p238_p1 = scmp.lt.s32.totalorder %s819_s24, 3 }
   0x4   : > { %p239_p2 = pnand %p685_p0, %p238_p1 }
   0x5   : > { %v795_v0 = vld [vmem:[%s949_s1] sm:$0xff] (!%p239_p2)   ;;  %s686_s28 = sshll.u32 (!%p239_p2), %s681_s25, 2  ;;  %v796_v1 = vld [vmem:[%s949_s1 + $0x8] sm:$0xff] (!%p239_p2)   ;;  %v799_v4 = vld [vmem:[%s951_s3 + $0x10] sm:$0xff] (!%p239_p2)   ;;  %vm312_vm0 = vcmask (!%p239_p2), 261120   ;;  %vm620_vm1 = vcmask (!%p239_p2), 130048  }
   0x6   : > { %242 = sbr.rel (%p239_p2) target bundleno = 682 (0x2aa), region = 48  ;;  %p271_p3 = scmp.lt.s32.totalorder (!%p239_p2), %s686_s28, 7  ;;  %739 = vmatprep.subr.bf16.mxu0 (!%p239_p2), %v795_v0  ;;  %v797_v2 = vld [vmem:[%s951_s3] sm:$0xff] (!%p239_p2)   ;;  %v798_v3 = vld [vmem:[%s951_s3 + $0x8] sm:$0xff] (!%p239_p2)   ;;  %v800_v11 = vld [vmem:[%s951_s3 + $0x18] sm:$0xff] (!%p239_p2)  }
   0x7   : > { %740 = vmatpush3.bf16.msra.mxu0 (!%p239_p2), %v795_v0  ;;  %747 = vmatprep.subr.bf16.mxu1 (!%p239_p2), %v797_v2  ;;  %v801_v12 = vld [vmem:[%s951_s3 + $0x20] sm:$0xff] (!%p239_p2)   ;;  %v802_v13 = vld [vmem:[%s951_s3 + $0x28] sm:$0xff] (!%p239_p2)   ;;  %v803_v14 = vld [vmem:[%s951_s3 + $0x30] sm:$0xff] (!%p239_p2)  }
   0x8   : > { %741 = vmatprep.subr.bf16.mxu0 (!%p239_p2), %v796_v1  ;;  %748 = vmatpush3.bf16.msra.mxu1 (!%p239_p2), %v797_v2  ;;  %v804_v15 = vld [vmem:[%s951_s3 + $0x38] sm:$0xff] (!%p239_p2)   ;;  %v805_v16 = vld [vmem:[%s953_s5] sm:$0xff] (!%p239_p2)   ;;  %v806_v17 = vld [vmem:[%s953_s5 + $0x8] sm:$0xff] (!%p239_p2)  }
   0x9   : > { %749 = vmatprep.subr.bf16.mxu1 (!%p239_p2), %v798_v3  ;;  %v807_v18 = vld [vmem:[%s953_s5 + $0x10] sm:$0xff] (!%p239_p2)   ;;  %v808_v19 = vld [vmem:[%s953_s5 + $0x18] sm:$0xff] (!%p239_p2)   ;;  %v809_v20 = vld [vmem:[%s953_s5 + $0x20] sm:$0xff] (!%p239_p2)  }
   0xa   : > { %v810_v21 = vld [vmem:[%s953_s5 + $0x28] sm:$0xff] (!%p239_p2)   ;;  %v690_v22 = vld [vmem:[%s950_s2] ss:$0 sm:$0xff] (!%p239_p2)  ;;  %v811_v37 = vld [vmem:[%s953_s5 + $0x30] sm:$0xff] (!%p239_p2)  }
   0xb   : > { %742 = vmatpush3.bf16.msra.mxu0 (!%p239_p2), %v796_v1  ;;  %v812_v38 = vld [vmem:[%s953_s5 + $0x38] sm:$0xff] (!%p239_p2)   ;;  %v695_v39 = vld [vmem:[%s952_s4] ss:$0 sm:$0xff] (!%p239_p2) }
   0xc   : > { %750 = vmatpush3.bf16.msra.mxu1 (!%p239_p2), %v798_v3  ;;  %767 = vmatprep.subr.bf16.mxu0 (!%p239_p2), %v805_v16  ;;  %v704_v54 = vld [vmem:[%s954_s6] ss:$0 sm:$0xff] (!%p239_p2) }
   0xd   : > { %s957_s28 = smov (!%p271_p3, %s686_s28), 7  ;;  %751 = vmatprep.subr.bf16.mxu1 %v799_v4 }
   0xe   : > { %s687_s12 = sshll.u32 %s957_s28, 3 }
   0xf   : > { %s274_s15 = scalar_lea.vmem %s948_s0, %s687_s12  ;;  %s280_s11 = scalar_lea.vmem %s955_s7, %s687_s12 }
  0x10   : > { %v283_v5 = vld [vmem:[%s274_s15] sm:$0xff]  ;;  %v284_v6 = vld [vmem:[%s274_s15 + $0x8] sm:$0xff]  ;;  %v285_v7 = vld [vmem:[%s274_s15 + $0x10] sm:$0xff]  ;;  %752 = vmatpush3.bf16.msra.mxu1 %v799_v4 }
  0x11   : > { %v287_v8 = vpack.c.bf16 %v284_v6, %v283_v5  ;;  %v286_v9 = vld [vmem:[%s274_s15 + $0x18] sm:$0xff]  ;;  %753 = vmatprep.subr.bf16.mxu1 %v800_v11 }
  0x12   : > { %v288_v10 = vpack.c.bf16 %v286_v9, %v285_v7 }
  0x13   : > { %743 = vmatprep.mubr.msk.bf16.mxu0 %vm312_vm0, %v287_v8 }
  0x14   : > { %744 = vmatmul.mubr.msk.bf16.vlgmr.msra.gmra.mrb[0].mxu0 %vm312_vm0, %v288_v10  ;;  %754 = vmatpush3.bf16.msra.mxu1 %v800_v11 }
  0x15   : > { %755 = vmatprep.subr.bf16.mxu1 %v801_v12  ;;  %768 = vmatpush3.bf16.msra.mxu0 %v805_v16 }
  0x16   : > { %769 = vmatprep.subr.bf16.mxu0 %v806_v17 }
  0x18   : > { %756 = vmatpush3.bf16.msra.mxu1 %v801_v12 }
  0x19   : > { %757 = vmatprep.subr.bf16.mxu1 %v802_v13  ;;  %770 = vmatpush3.bf16.msra.mxu0 %v806_v17 }
  0x1a   : > { %771 = vmatprep.subr.bf16.mxu0 %v807_v18 }
  0x1c   : > { %758 = vmatpush3.bf16.msra.mxu1 %v802_v13 }
  0x1d   : > { %759 = vmatprep.subr.bf16.mxu1 %v803_v14  ;;  %772 = vmatpush3.bf16.msra.mxu0 %v807_v18 }
  0x1e   : > { %773 = vmatprep.subr.bf16.mxu0 %v808_v19 }
  0x20   : > { %760 = vmatpush3.bf16.msra.mxu1 %v803_v14 }
  0x21   : > { %761 = vmatprep.subr.bf16.mxu1 %v804_v15  ;;  %774 = vmatpush3.bf16.msra.mxu0 %v808_v19 }
  0x22   : > { %775 = vmatprep.subr.bf16.mxu0 %v809_v20 }
  0x24   : > { %762 = vmatpush3.bf16.msra.mxu1 %v804_v15 }
  0x25   : > { %776 = vmatpush3.bf16.msra.mxu0 %v809_v20 }
  0x26   : > { %777 = vmatprep.subr.bf16.mxu0 %v810_v21 }
  0x29   : > { %778 = vmatpush3.bf16.msra.mxu0 %v810_v21 }
  0x2a   : > { %779 = vmatprep.subr.bf16.mxu0 %v811_v37 }
  0x2d   : > { %780 = vmatpush3.bf16.msra.mxu0 %v811_v37 }
  0x2e   : > { %781 = vmatprep.subr.bf16.mxu0 %v812_v38 }
  0x31   : > { %782 = vmatpush3.bf16.msra.mxu0 %v812_v38 }
  0xe7   : > { %v745_v23 = vpop.f32.mrb[0].mxu0 }
  0xe8   : > { %v362_v24 = vadd.f32 %v745_v23, %v690_v22  ;;  %v353_v25 = vpop.f32.mrb[1].mxu0 }
  0xe9   : > { %v354_v26 = vadd.f32 %v690_v22, %v353_v25  ;;  %v746_v27 = vpop.f32.mrb[2].mxu0 }
  0xea   : > { %v365_v28 = vadd.f32 %v746_v27, %v690_v22  ;;  %v356_v29 = vpop.f32.mrb[3].mxu0  ;;  %v370_v31 = vmax.f32 %v362_v24, 0.0 }
  0xeb   : > { %v357_v30 = vadd.f32 %v690_v22, %v356_v29  ;;  %v368_v33 = vmax.f32 %v354_v26, 0.0 }
  0xec   : > { %v371_v32 = vmax.f32 %v365_v28, 0.0 }
  0xed   : > { %v369_v34 = vmax.f32 %v357_v30, 0.0 }
  0xee   : > { %v373_v35 = vpack.c.bf16 %v371_v32, %v370_v31 }
  0xef   : > { %v372_v36 = vpack.c.bf16 %v369_v34, %v368_v33 }
  0xf1   : > { %763 = vmatprep.mubr.bf16.mxu1 %v372_v36 }
  0xf2   : > { %764 = vmatmul.mubr.bf16.vlgmr.msra.gmra.mrb[0].mxu1 %v373_v35 }
 0x1c5   : > { %v765_v40 = vpop.f32.mrb[0].mxu1 }
 0x1c6   : > { %v488_v41 = vadd.f32 %v765_v40, %v695_v39  ;;  %v479_v42 = vpop.f32.mrb[1].mxu1 }
 0x1c7   : > { %v480_v43 = vadd.f32 %v695_v39, %v479_v42  ;;  %v766_v44 = vpop.f32.mrb[2].mxu1 }
 0x1c8   : > { %v491_v45 = vadd.f32 %v766_v44, %v695_v39  ;;  %v482_v46 = vpop.f32.mrb[3].mxu1  ;;  %v496_v48 = vmax.f32 %v488_v41, 0.0 }
 0x1c9   : > { %v483_v47 = vadd.f32 %v695_v39, %v482_v46  ;;  %v494_v50 = vmax.f32 %v480_v43, 0.0 }
 0x1ca   : > { %v497_v49 = vmax.f32 %v491_v45, 0.0 }
 0x1cb   : > { %v495_v51 = vmax.f32 %v483_v47, 0.0 }
 0x1cc   : > { %v499_v52 = vpack.c.bf16 %v497_v49, %v496_v48 }
 0x1cd   : > { %v498_v53 = vpack.c.bf16 %v495_v51, %v494_v50 }
 0x1cf   : > { %783 = vmatprep.mubr.bf16.mxu0 %v498_v53 }
 0x1d0   : > { %784 = vmatmul.mubr.bf16.vlgmr.msra.gmra.mrb[4].mxu0 %v499_v52 }
 0x2a3   : > { %v785_v55 = vpop.f32.mrb[4].mxu0 }
 0x2a4   : > { %v605_v56 = vpop.f32.mrb[5].mxu0  ;;  %v614_v61 = vadd.f32 %v785_v55, %v704_v54 }
 0x2a5   : > { %v606_v57 = vadd.f32 %v704_v54, %v605_v56  ;;  %v786_v58 = vpop.f32.mrb[6].mxu0 }
 0x2a6   : > { %v608_v59 = vpop.f32.mrb[7].mxu0  ;;  %v617_v62 = vadd.f32 %v786_v58, %v704_v54  ;;  %623 = vst.msk [vmem:[%s280_s11 + $0x10] sm:$0xff] %vm620_vm1, %v614_v61 }
 0x2a7   : > { %621 = vst.msk [vmem:[%s280_s11] sm:$0xff] %vm620_vm1, %v606_v57  ;;  %v609_v60 = vadd.f32 %v704_v54, %v608_v59 }
 0x2a8   : > { %624 = vst.msk [vmem:[%s280_s11 + $0x18] sm:$0xff] %vm620_vm1, %v617_v62 }
 0x2a9   : > { %622 = vst.msk [vmem:[%s280_s11 + $0x8] sm:$0xff] %vm620_vm1, %v609_v60 }
 0x2aa PF: > { %s17_s24 = sadd.s32 1, %s819_s24  }
 0x2ab   : > { %p14_p4 = scmp.ge.s32.totalorder %s17_s24, 4  }
 0x2ad   :  { %16 = sbr.rel (!%p14_p4) target bundleno = 1 (0x1), region = 78 }

</bundles_post_ra>
